<compile_context>
chip_gen: v6e
topology: v6e:2x2x1
jax: 0.10.0
libtpu: 0.0.40
codegen_flags: <defaults>
</compile_context>

<pallas_src>
import functools

import jax
import jax.numpy as jnp
from jax.experimental import pallas as pl
from jax.experimental.pallas import tpu as pltpu


def _round_up(x, m):
    return (x + m - 1) // m * m


def gcn_layer_kernel(a_ref, z_ref, w_ref, b_ref, o_ref, acc_ref, *, apply_relu):
    """One GraphConv layer tile: o = maybe_relu((A @ Z) @ W + b).

    Grid: (row tiles, A-column/reduction tiles). acc_ref holds the running f32 A @ Z sum.
    """
    k = pl.program_id(1)

    @pl.when(k == 0)
    def _():
        acc_ref[...] = jnp.zeros_like(acc_ref)

    # A contraction against the narrow (128-lane padded) feature dim: bf16 MXU, f32 accumulate.
    acc_ref[...] += jnp.dot(a_ref[...], z_ref[...], preferred_element_type=jnp.float32)

    @pl.when(k == pl.num_programs(1) - 1)
    def _():
        # Projection + bias (+ ReLU) once per output row tile, after the full A-sum.
        y = jnp.dot(acc_ref[...].astype(jnp.bfloat16), w_ref[...],
                    preferred_element_type=jnp.float32)
        y = y + b_ref[...]
        if apply_relu:
            y = jnp.maximum(y, 0.0)
        o_ref[...] = y.astype(o_ref.dtype)


def _gcn_layer(a_p, z_p, w_p, b_p, *, apply_relu, out_dtype, tm=256, tk=256):
    """pallas_call wrapper for one layer on padded inputs.

    a_p: (Np, Np) bf16, z_p: (Np, Fz) bf16, w_p: (Fz, Fo) bf16, b_p: (1, Fo) f32.
    Np is a multiple of tm and tk; Fz, Fo are multiples of 128 (lane-dense).
    """
    np_ = a_p.shape[0]
    fz = z_p.shape[1]
    fo = w_p.shape[1]
    tm = min(tm, np_)
    tk = min(tk, np_)
    grid = (np_ // tm, np_ // tk)

    # VMEM budget derived from double-buffered block sizes + accumulator, with headroom,
    # capped well under v7x's 64 MiB per-TensorCore VMEM.
    blk_bytes = (tm * tk * 2) + (tk * fz * 2) + (fz * fo * 2) + (fo * 4) + (tm * fo * 4)
    vmem_bytes = min(max(4 * blk_bytes + tm * fz * 4 + (4 << 20), 8 << 20), 48 << 20)

    kernel = functools.partial(gcn_layer_kernel, apply_relu=apply_relu)
    return pl.pallas_call(
        kernel,
        out_shape=jax.ShapeDtypeStruct((np_, fo), out_dtype),
        grid_spec=pltpu.PrefetchScalarGridSpec(
            num_scalar_prefetch=0,
            grid=grid,
            in_specs=[
                pl.BlockSpec((tm, tk), lambda i, k: (i, k)),   # A_hat tile (streams over k)
                pl.BlockSpec((tk, fz), lambda i, k: (k, 0)),   # feature tile (streams over k)
                pl.BlockSpec((fz, fo), lambda i, k: (0, 0)),   # weight (resident)
                pl.BlockSpec((1, fo), lambda i, k: (0, 0)),    # bias (resident)
            ],
            out_specs=pl.BlockSpec((tm, fo), lambda i, k: (i, 0)),
            scratch_shapes=[pltpu.VMEM((tm, fz), jnp.float32)],
        ),
        compiler_params=pltpu.CompilerParams(
            dimension_semantics=("parallel", "arbitrary"),
            vmem_limit_bytes=vmem_bytes,
        ),
    )(a_p, z_p, w_p, b_p)


def gcn_forward(a_hat, x, w1, b1, w2, b2, *, tm=256, tk=256):
    """Two-layer GCN forward with tiled, pipelined Pallas kernels.

    a_hat : (N, N) float32 normalized adjacency
    x     : (N, Fin) float32 node features
    w1    : (Fin, H), b1 : (1, H)
    w2    : (H, Fin), b2 : (1, Fin)
    returns (N, Fin) float32
    """
    n, fin = x.shape
    h_feats = w1.shape[1]
    lane = 128

    np_ = _round_up(n, max(tm, tk))
    fin_p = _round_up(fin, lane)
    h_p = _round_up(h_feats, lane)

    f32, bf16 = jnp.float32, jnp.bfloat16
    # Zero-padding keeps the math exact: padded feature columns / adjacency columns contribute 0.
    a_pad = jnp.zeros((np_, np_), bf16).at[:n, :n].set(a_hat.astype(bf16))
    x_pad = jnp.zeros((np_, fin_p), bf16).at[:n, :fin].set(x.astype(bf16))
    w1_pad = jnp.zeros((fin_p, h_p), bf16).at[:fin, :h_feats].set(w1.astype(bf16))
    b1_pad = jnp.zeros((1, h_p), f32).at[:, :h_feats].set(b1.astype(f32))
    w2_pad = jnp.zeros((h_p, fin_p), bf16).at[:h_feats, :fin].set(w2.astype(bf16))
    b2_pad = jnp.zeros((1, fin_p), f32).at[:, :fin].set(b2.astype(f32))

    # Layer 1: h = relu((A @ X) @ W1 + b1)  -- A contracted against the narrow feature dim.
    h = _gcn_layer(a_pad, x_pad, w1_pad, b1_pad,
                   apply_relu=True, out_dtype=bf16, tm=tm, tk=tk)
    # Layer 2: out = (A @ h) @ W2 + b2
    out = _gcn_layer(a_pad, h, w2_pad, b2_pad,
                     apply_relu=False, out_dtype=f32, tm=tm, tk=tk)
    return out[:n, :fin]


def build_normalized_adjacency(src, dst, num_nodes):
    """Dense A_hat = D_in^{-1/2} A D_out^{-1/2}, degrees clamped to >= 1 (DGL behavior)."""
    a = jnp.zeros((num_nodes, num_nodes), jnp.float32)
    # A[i, j] = 1 means an edge j -> i, so aggregation over in-edges is A @ X.
    a = a.at[dst, src].add(1.0)
    out_deg = jnp.clip(a.sum(axis=0), 1.0, None)   # out-degree of each source node
    in_deg = jnp.clip(a.sum(axis=1), 1.0, None)    # in-degree of each destination node
    return (in_deg[:, None] ** -0.5) * a * (out_deg[None, :] ** -0.5)


def gcn_reference(a_hat, x, w1, b1, w2, b2):
    h = jnp.maximum(a_hat @ x @ w1 + b1, 0.0)
    return a_hat @ h @ w2 + b2


if __name__ == "__main__":
    # Small synthetic graph consistent with the module: N nodes, in_feats -> h_feats -> in_feats.
    num_nodes = 8
    in_feats = 4
    h_feats = 32

    key = jax.random.PRNGKey(0)
    k_x, k_e, k_w1, k_w2 = jax.random.split(key, 4)

    # Deterministic random edges (including possible zero in-degree nodes).
    num_edges = 16
    src = jax.random.randint(k_e, (num_edges,), 0, num_nodes)
    dst = jax.random.randint(jax.random.fold_in(k_e, 1), (num_edges,), 0, num_nodes)
    a_hat = build_normalized_adjacency(src, dst, num_nodes)

    # Node features.
    x = jax.random.normal(k_x, (num_nodes, in_feats), jnp.float32)

    # Deterministic parameter init (GraphConv: xavier-uniform weight, zero bias).
    def xavier(k, shape):
        bound = (6.0 / (shape[0] + shape[1])) ** 0.5
        return jax.random.uniform(k, shape, jnp.float32, -bound, bound)

    w1 = xavier(k_w1, (in_feats, h_feats))
    b1 = jnp.zeros((1, h_feats), jnp.float32)
    w2 = xavier(k_w2, (h_feats, in_feats))
    b2 = jnp.zeros((1, in_feats), jnp.float32)

    out = gcn_forward(a_hat, x, w1, b1, w2, b2)
    out = jax.block_until_ready(out)

    ref = gcn_reference(a_hat, x, w1, b1, w2, b2)
    assert out.shape == (num_nodes, in_feats)
    # bf16 MXU inputs with f32 accumulation: compare against the f32 reference at bf16 tolerance.
    assert jnp.allclose(out, ref, atol=5e-2, rtol=5e-2), "mismatch vs pure-JAX reference"

    print("KERNEL_OK")
</pallas_src>

<mosaic_0001>
module attributes {stable_mosaic.version = 11 : i64} {
  func.func @gcn_layer_kernel(%arg0: i32, %arg1: i32, %arg2: memref<256x256xbf16, #tpu.memory_space<vmem>>, %arg3: memref<256x128xbf16, #tpu.memory_space<vmem>>, %arg4: memref<128x128xbf16, #tpu.memory_space<vmem>>, %arg5: memref<1x128xf32, #tpu.memory_space<vmem>>, %arg6: memref<256x128xbf16, #tpu.memory_space<vmem>>, %arg7: memref<256x128xf32, #tpu.memory_space<vmem>>) attributes {dimension_semantics = [#tpu.dimension_semantics<parallel>, #tpu.dimension_semantics<arbitrary>], iteration_bounds = array<i64: 1, 1>, scalar_prefetch = 0 : i64, scratch_operands = 1 : i64, tpu.core_type = #tpu.core_type<tc>, window_params = [{transform_indices = @transform_0, window_bounds = array<i64: 256, 256>}, {transform_indices = @transform_1, window_bounds = array<i64: 256, 128>}, {pipeline_mode = #tpu.pipeline_mode<synchronous>, transform_indices = @transform_2, window_bounds = array<i64: 128, 128>}, {pipeline_mode = #tpu.pipeline_mode<synchronous>, transform_indices = @transform_3, window_bounds = array<i64: 1, 128>}, {transform_indices = @transform_4, window_bounds = array<i64: 256, 128>}]} {
    %c0_i32 = arith.constant 0 : i32
    %0 = arith.cmpi eq, %arg1, %c0_i32 : i32
    %1 = arith.extui %0 : i1 to i32
    %c0_i32_0 = arith.constant 0 : i32
    %2 = arith.cmpi ne, %1, %c0_i32_0 : i32
    scf.if %2 {
      %cst_10 = arith.constant 0.000000e+00 : f32
      %12 = vector.broadcast %cst_10 : f32 to vector<256x128xf32>
      %c0_11 = arith.constant 0 : index
      %c0_12 = arith.constant 0 : index
      %13 = vector.load %arg7[%c0_11, %c0_12] : memref<256x128xf32, #tpu.memory_space<vmem>>, vector<256x128xf32>
      tpu.vector_store %arg7[%c0_11, %c0_12], %12 {strides = array<i32>} : memref<256x128xf32, #tpu.memory_space<vmem>>, vector<256x128xf32>,
    } else {
    }
    %c0 = arith.constant 0 : index
    %c0_1 = arith.constant 0 : index
    %3 = vector.load %arg7[%c0, %c0_1] : memref<256x128xf32, #tpu.memory_space<vmem>>, vector<256x128xf32>
    %c0_2 = arith.constant 0 : index
    %c0_3 = arith.constant 0 : index
    %4 = vector.load %arg2[%c0_2, %c0_3] : memref<256x256xbf16, #tpu.memory_space<vmem>>, vector<256x256xbf16>
    %c0_4 = arith.constant 0 : index
    %c0_5 = arith.constant 0 : index
    %5 = vector.load %arg3[%c0_4, %c0_5] : memref<256x128xbf16, #tpu.memory_space<vmem>>, vector<256x128xbf16>
    %cst = arith.constant dense<0.000000e+00> : vector<256x128xf32>
    %6 = tpu.matmul %4, %5, %cst {dimension_numbers = #tpu.dot_dimension_numbers<[1], [0], [0], [1], [0, 0, 1, 1], [], []>} : vector<256x256xbf16>, vector<256x128xbf16>, vector<256x128xf32> -> vector<256x128xf32>
    %7 = arith.addf %3, %6 : vector<256x128xf32>
    %c0_6 = arith.constant 0 : index
    %c0_7 = arith.constant 0 : index
    %8 = vector.load %arg7[%c0_6, %c0_7] : memref<256x128xf32, #tpu.memory_space<vmem>>, vector<256x128xf32>
    tpu.vector_store %arg7[%c0_6, %c0_7], %7 {strides = array<i32>} : memref<256x128xf32, #tpu.memory_space<vmem>>, vector<256x128xf32>,
    %c0_i32_8 = arith.constant 0 : i32
    %9 = arith.cmpi eq, %arg1, %c0_i32_8 : i32
    %10 = arith.extui %9 : i1 to i32
    %c0_i32_9 = arith.constant 0 : i32
    %11 = arith.cmpi ne, %10, %c0_i32_9 : i32
    scf.if %11 {
      %c0_10 = arith.constant 0 : index
      %c0_11 = arith.constant 0 : index
      %12 = vector.load %arg7[%c0_10, %c0_11] : memref<256x128xf32, #tpu.memory_space<vmem>>, vector<256x128xf32>
      %13 = arith.truncf %12 : vector<256x128xf32> to vector<256x128xbf16>
      %c0_12 = arith.constant 0 : index
      %c0_13 = arith.constant 0 : index
      %14 = vector.load %arg4[%c0_12, %c0_13] : memref<128x128xbf16, #tpu.memory_space<vmem>>, vector<128x128xbf16>
      %cst_14 = arith.constant dense<0.000000e+00> : vector<256x128xf32>
      %15 = tpu.matmul %13, %14, %cst_14 {dimension_numbers = #tpu.dot_dimension_numbers<[1], [0], [0], [1], [0, 0, 1, 1], [], []>} : vector<256x128xbf16>, vector<128x128xbf16>, vector<256x128xf32> -> vector<256x128xf32>
      %c0_15 = arith.constant 0 : index
      %c0_16 = arith.constant 0 : index
      %16 = vector.load %arg5[%c0_15, %c0_16] : memref<1x128xf32, #tpu.memory_space<vmem>>, vector<1x128xf32>
      %17 = vector.broadcast %16 : vector<1x128xf32> to vector<256x128xf32>
      %18 = arith.addf %15, %17 : vector<256x128xf32>
      %cst_17 = arith.constant 0.000000e+00 : f32
      %19 = vector.broadcast %cst_17 : f32 to vector<256x128xf32>
      %20 = arith.maximumf %18, %19 : vector<256x128xf32>
      %21 = arith.truncf %20 : vector<256x128xf32> to vector<256x128xbf16>
      %c0_18 = arith.constant 0 : index
      %c0_19 = arith.constant 0 : index
      %22 = vector.load %arg6[%c0_18, %c0_19] : memref<256x128xbf16, #tpu.memory_space<vmem>>, vector<256x128xbf16>
      tpu.vector_store %arg6[%c0_18, %c0_19], %21 {strides = array<i32>} : memref<256x128xbf16, #tpu.memory_space<vmem>>, vector<256x128xbf16>,
    } else {
    }
    return
  }
  func.func @transform_0(%arg0: i32, %arg1: i32) -> (i32, i32) {
    %c0_i32 = arith.constant 0 : i32
    return %arg0, %arg1 : i32, i32
  }
  func.func @transform_1(%arg0: i32, %arg1: i32) -> (i32, i32) {
    %c0_i32 = arith.constant 0 : i32
    %c0_i32_0 = arith.constant 0 : i32
    return %arg1, %c0_i32 : i32, i32
  }
  func.func @transform_2(%arg0: i32, %arg1: i32) -> (i32, i32) {
    %c0_i32 = arith.constant 0 : i32
    %c0_i32_0 = arith.constant 0 : i32
    %c0_i32_1 = arith.constant 0 : i32
    return %c0_i32, %c0_i32_0 : i32, i32
  }
  func.func @transform_3(%arg0: i32, %arg1: i32) -> (i32, i32) {
    %c0_i32 = arith.constant 0 : i32
    %c0_i32_0 = arith.constant 0 : i32
    %c0_i32_1 = arith.constant 0 : i32
    return %c0_i32, %c0_i32_0 : i32, i32
  }
  func.func @transform_4(%arg0: i32, %arg1: i32) -> (i32, i32) {
    %c0_i32 = arith.constant 0 : i32
    %c0_i32_0 = arith.constant 0 : i32
    return %arg0, %c0_i32 : i32, i32
  }
}

</mosaic_0001>

<bundles_post_ra>
// kernel: tpu_custom_call.1
= control target key start
LH: loop header
LB: loop body
LE: loop exit
PB: predicated region body
PF: predicated region fallthrough
CT: control target
= control target key end

     0   :  { %9 = vsyncpa [#allocation4], 0  ;;  %s1839_s0 = inlined_call_operand.hbm [shape: bf16[256,256], index: 0, kind: input, shape index: {}]   ;;  %s1840_s1 = inlined_call_operand.hbm [shape: bf16[256,128], index: 1, kind: input, shape index: {}]   ;;  %s1841_s2 = inlined_call_operand.hbm [shape: bf16[128,128], index: 2, kind: input, shape index: {}]   ;;  %s1842_s3 = inlined_call_operand.vmem [shape: f32[1,128], index: 3, kind: input, shape index: {}]   ;;  %s1843_s4 = inlined_call_operand.hbm [shape: bf16[256,128], index: 4, kind: output, shape index: {}]  }
   0x1   :  { %10 = vsyncpa [#allocation7], 0 }
   0x2   :  { %11 = vsyncpa [#allocation5], 0  ;;  %s1748_s15 = smov [#allocation6]  }
   0x3   :  { %s29_s16 = sshll.u32 %s1748_s15, 4  ;;  %s30_s16 = int_to_ptr.vmem [resolvable:$true] %s29_s16 }
   0x4   :  { %s1670_s17 = scalar_lea.vmem %s30_s16, 2048  ;;  %p1675_p1 = scmp.lt.s32.totalorder %s30_s16, %s30_s16 }
   0x5   :  { %p1671_p0 = scmp.ne.s32.totalorder %s30_s16, %s1670_s17  ;;  %p1676_p2 = scmp.lt.s32.totalorder %s1670_s17, %s1670_s17 }
   0x7   :  { %p1677_p3 = por %p1676_p2, %p1675_p1 }
   0x9   :  { %p1678_p4 = pnand %p1677_p3, %p1671_p0 }
   0xb   :  { %1681 = shalt.err (!%p1678_p4)
}
   0xc   :  { %s1749_s18 = smov 64   ;;  %s1750_s19 = smov 4  }
   0xd   :  { %35 = dma.hbm_to_vmem [thread:$0]  %s1840_s1, 2048, %s30_s16, [#allocation7], %s1749_s18, %s1749_s18, %s1750_s19  }
   0xe   :  { %s1751_s22 = smov [#allocation3]  }
   0xf   :  { %s17_s23 = sshll.u32 %s1751_s22, 4  ;;  %s18_s23 = int_to_ptr.vmem [resolvable:$true] %s17_s23 }
  0x10   :  { %s1690_s24 = scalar_lea.vmem %s18_s23, 4096  ;;  %p1695_p6 = scmp.lt.s32.totalorder %s18_s23, %s18_s23 }
  0x11   :  { %p1691_p5 = scmp.ne.s32.totalorder %s18_s23, %s1690_s24  ;;  %p1696_p7 = scmp.lt.s32.totalorder %s1690_s24, %s1690_s24 }
  0x13   :  { %p1697_p8 = por %p1696_p7, %p1695_p6 }
  0x15   :  { %p1698_p9 = pnand %p1697_p8, %p1691_p5 }
  0x17   :  { %1701 = shalt.err (!%p1698_p9)
}
  0x18   :  { %s1752_s25 = smov 128   ;;  %s1753_s26 = smov 8  }
  0x19   :  { %23 = dma.hbm_to_vmem [thread:$0]  %s1839_s0, 4096, %s18_s23, [#allocation4], %s1752_s25, %s1752_s25, %s1753_s26  }
  0x1a   :  { %s1754_s29 = smov [#allocation8]  }
  0x1b   :  { %s41_s30 = sshll.u32 %s1754_s29, 4  ;;  %s42_s30 = int_to_ptr.vmem [resolvable:$true] %s41_s30 }
  0x1c   :  { %s1710_s1 = scalar_lea.vmem %s42_s30, 1024  ;;  %p1715_p11 = scmp.lt.s32.totalorder %s42_s30, %s42_s30 }
  0x1d   :  { %p1711_p10 = scmp.ne.s32.totalorder %s42_s30, %s1710_s1  ;;  %p1716_p12 = scmp.lt.s32.totalorder %s1710_s1, %s1710_s1 }
  0x1f   :  { %p1717_p13 = por %p1716_p12, %p1715_p11 }
  0x21   :  { %p1718_p0 = pnand %p1717_p13, %p1711_p10 }
  0x23   :  { %1721 = shalt.err (!%p1718_p0)
}
  0x24   :  { %47 = dma.hbm_to_vmem [thread:$0]  %s1841_s2, 1024, %s42_s30, [#allocation7], %s1749_s18, %s1749_s18, %s1750_s19  }
  0x25   :  { %1742 = dma.done.wait [#allocation4], 4096  }
  0x26   :  { %1743 = vsyncadd [#allocation4], 4294963200 }
  0x27   :  { %1744 = dma.done.wait [#allocation7], 3072  }
  0x28   :  { %1745 = vsyncadd [#allocation7], 4294964224  ;;  %v1590_v0 = vld [vmem:[#allocation6 + $0x78] sm:$0xff]   ;;  %v1592_v2 = vld [vmem:[#allocation6 + $0x70] sm:$0xff]  }
  0x29   :  { %v1591_v1 = vld [vmem:[#allocation6 + $0x38] sm:$0xff]   ;;  %1382 = vmatprep.subr.bf16.mxu0 %v1590_v0  ;;  %1566 = vmatprep.subr.bf16.mxu1 %v1590_v0  ;;  %v1593_v3 = vld [vmem:[#allocation6 + $0x30] sm:$0xff]   ;;  %v1594_v4 = vld [vmem:[#allocation6 + $0x68] sm:$0xff]  }
  0x2a   :  { %1383 = vmatpush3.bf16.msra.mxu0 %v1591_v1  ;;  %1574 = vmatpush3.bf16.msra.mxu1 %v1591_v1  ;;  %v1595_v5 = vld [vmem:[#allocation6 + $0x28] sm:$0xff]   ;;  %v1596_v6 = vld [vmem:[#allocation6 + $0x60] sm:$0xff]   ;;  %v1598_v8 = vld [vmem:[#allocation6 + $0x58] sm:$0xff]  }
  0x2b   :  { %1384 = vmatprep.subr.bf16.mxu0 %v1592_v2  ;;  %1567 = vmatprep.subr.bf16.mxu1 %v1592_v2  ;;  %v1597_v7 = vld [vmem:[#allocation6 + $0x20] sm:$0xff]   ;;  %v1599_v9 = vld [vmem:[#allocation6 + $0x18] sm:$0xff]   ;;  %v1600_v10 = vld [vmem:[#allocation6 + $0x50] sm:$0xff]  }
  0x2c   :  { %v1608_v11 = vld [vmem:[#allocation3 + $0x4] ss:$8 sps:$4 sm:$0xff]   ;;  %v1601_v12 = vld [vmem:[#allocation6 + $0x10] sm:$0xff]   ;;  %v1606_v17 = vld [vmem:[#allocation3] ss:$8 sps:$4 sm:$0xff]  }
  0x2d   :  { %480 = vmatprep.mubr.bf16.mxu0 %v1608_v11  ;;  %v1602_v13 = vld [vmem:[#allocation6 + $0x48] sm:$0xff]   ;;  %v1604_v15 = vld [vmem:[#allocation6 + $0x40] sm:$0xff]   ;;  %v1609_v19 = vld [vmem:[#allocation3 + $0x14] ss:$8 sps:$4 sm:$0xff]  }
  0x2e   :  { %1385 = vmatpush3.bf16.msra.mxu0 %v1593_v3  ;;  %1575 = vmatpush3.bf16.msra.mxu1 %v1593_v3  ;;  %v1603_v14 = vld [vmem:[#allocation6 + $0x8] sm:$0xff]   ;;  %v1605_v16 = vld [vmem:[#allocation6] sm:$0xff]   ;;  %v1642_v21 = vld [vmem:[#allocation3 + $0xd4] ss:$8 sps:$4 sm:$0xff]  }
  0x2f   :  { %1386 = vmatprep.subr.bf16.mxu0 %v1594_v4  ;;  %1568 = vmatprep.subr.bf16.mxu1 %v1594_v4  ;;  %v1638_v18 = vld [vmem:[#allocation3 + $0xc4] ss:$8 sps:$4 sm:$0xff]   ;;  %v1636_v20 = vld [vmem:[#allocation3 + $0xc0] ss:$8 sps:$4 sm:$0xff]   ;;  %v1611_v22 = vld [vmem:[#allocation3 + $0x10] ss:$8 sps:$4 sm:$0xff]  }
  0x30   :  { %576 = vmatprep.mubr.bf16.mxu1 %v1638_v18  ;;  %v1612_v23 = vld [vmem:[#allocation3 + $0x24] ss:$8 sps:$4 sm:$0xff]   ;;  %v1644_v24 = vld [vmem:[#allocation3 + $0xd0] ss:$8 sps:$4 sm:$0xff]   ;;  %v1614_v29 = vld [vmem:[#allocation3 + $0x20] ss:$8 sps:$4 sm:$0xff]  }
  0x31   :  { %v1654_v25 = vld [vmem:[#allocation8 + $0x38] sm:$0xff]   ;;  %v1655_v26 = vld [vmem:[#allocation8 + $0x30] sm:$0xff]   ;;  %v1648_v27 = vld [vmem:[#allocation3 + $0xe4] ss:$8 sps:$4 sm:$0xff]  }
  0x32   :  { %1387 = vmatpush3.bf16.msra.mxu0 %v1595_v5  ;;  %1576 = vmatpush3.bf16.msra.mxu1 %v1595_v5  ;;  %v1656_v28 = vld [vmem:[#allocation8 + $0x28] sm:$0xff]   ;;  %v1657_v30 = vld [vmem:[#allocation8 + $0x20] sm:$0xff]   ;;  %v1615_v31 = vld [vmem:[#allocation3 + $0x34] ss:$8 sps:$4 sm:$0xff]  }
  0x33   :  { %1388 = vmatprep.subr.bf16.mxu0 %v1596_v6  ;;  %1569 = vmatprep.subr.bf16.mxu1 %v1596_v6  ;;  %v1650_v32 = vld [vmem:[#allocation3 + $0xe0] ss:$8 sps:$4 sm:$0xff]   ;;  %v1651_v33 = vld [vmem:[#allocation3 + $0xf4] ss:$8 sps:$4 sm:$0xff]   ;;  %v1617_v34 = vld [vmem:[#allocation3 + $0x30] ss:$8 sps:$4 sm:$0xff]  }
  0x34   :  { %v1618_v35 = vld [vmem:[#allocation3 + $0x44] ss:$8 sps:$4 sm:$0xff]   ;;  %v1653_v36 = vld [vmem:[#allocation3 + $0xf0] ss:$8 sps:$4 sm:$0xff]   ;;  %v1620_v37 = vld [vmem:[#allocation3 + $0x40] ss:$8 sps:$4 sm:$0xff]  }
  0x35   :  { %v1621_v38 = vld [vmem:[#allocation3 + $0x54] ss:$8 sps:$4 sm:$0xff]   ;;  %v1623_v39 = vld [vmem:[#allocation3 + $0x50] ss:$8 sps:$4 sm:$0xff]   ;;  %v1624_v40 = vld [vmem:[#allocation3 + $0x64] ss:$8 sps:$4 sm:$0xff]  }
  0x36   :  { %1389 = vmatpush3.bf16.msra.mxu0 %v1597_v7  ;;  %1577 = vmatpush3.bf16.msra.mxu1 %v1597_v7  ;;  %v1626_v41 = vld [vmem:[#allocation3 + $0x60] ss:$8 sps:$4 sm:$0xff]   ;;  %v1627_v42 = vld [vmem:[#allocation3 + $0x74] ss:$8 sps:$4 sm:$0xff]   ;;  %v1629_v43 = vld [vmem:[#allocation3 + $0x70] ss:$8 sps:$4 sm:$0xff]  }
  0x37   :  { %1390 = vmatprep.subr.bf16.mxu0 %v1598_v8  ;;  %1570 = vmatprep.subr.bf16.mxu1 %v1598_v8  ;;  %v1630_v44 = vld [vmem:[#allocation3 + $0x84] ss:$8 sps:$4 sm:$0xff]   ;;  %v1632_v45 = vld [vmem:[#allocation3 + $0x80] ss:$8 sps:$4 sm:$0xff]   ;;  %v1633_v46 = vld [vmem:[#allocation3 + $0x94] ss:$8 sps:$4 sm:$0xff]  }
  0x38   :  { %v1658_v47 = vld [vmem:[#allocation8 + $0x18] sm:$0xff]   ;;  %v1639_v49 = vld [vmem:[#allocation3 + $0xa4] ss:$8 sps:$4 sm:$0xff]   ;;  %v1659_v50 = vld [vmem:[#allocation8 + $0x10] sm:$0xff]  }
  0x39   :  { %v1635_v48 = vld [vmem:[#allocation3 + $0x90] ss:$8 sps:$4 sm:$0xff]   ;;  %v1660_v51 = vld [vmem:[#allocation8 + $0x8] sm:$0xff]   ;;  %v1645_v53 = vld [vmem:[#allocation3 + $0xb4] ss:$8 sps:$4 sm:$0xff]  }
  0x3a   :  { %1391 = vmatpush3.bf16.msra.mxu0 %v1599_v9  ;;  %1578 = vmatpush3.bf16.msra.mxu1 %v1599_v9  ;;  %v1641_v52 = vld [vmem:[#allocation3 + $0xa0] ss:$8 sps:$4 sm:$0xff]   ;;  %v1647_v55 = vld [vmem:[#allocation3 + $0xb0] ss:$8 sps:$4 sm:$0xff]  }
  0x3b   :  { %1392 = vmatprep.subr.bf16.mxu0 %v1600_v10  ;;  %1571 = vmatprep.subr.bf16.mxu1 %v1600_v10  ;;  %v1661_v54 = vld [vmem:[#allocation8] sm:$0xff]  }
  0x3e   :  { %1393 = vmatpush3.bf16.msra.mxu0 %v1601_v12  ;;  %1579 = vmatpush3.bf16.msra.mxu1 %v1601_v12 }
  0x3f   :  { %1394 = vmatprep.subr.bf16.mxu0 %v1602_v13  ;;  %1572 = vmatprep.subr.bf16.mxu1 %v1602_v13 }
  0x42   :  { %1395 = vmatpush3.bf16.msra.mxu0 %v1603_v14  ;;  %1580 = vmatpush3.bf16.msra.mxu1 %v1603_v14 }
  0x43   :  { %1396 = vmatprep.subr.bf16.mxu0 %v1604_v15  ;;  %1573 = vmatprep.subr.bf16.mxu1 %v1604_v15 }
  0x46   :  { %1397 = vmatpush3.bf16.msra.mxu0 %v1605_v16  ;;  %1581 = vmatpush3.bf16.msra.mxu1 %v1605_v16 }
  0x47   :  { %1518 = vmatprep.subr.bf16.mxu1 %v1654_v25 }
  0x49   :  { %481 = vmatmul.mubr.bf16.vlgmr.msra.gmra.mxu0 %v1606_v17  ;;  %577 = vmatmul.mubr.bf16.vlgmr.msra.gmra.mxu1 %v1636_v20 }
  0x4a   :  { %488 = vmatprep.mubr.bf16.mxu0 %v1609_v19  ;;  %584 = vmatprep.mubr.bf16.mxu1 %v1642_v21 }
  0x4b   :  { %1519 = vmatpush3.bf16.msra.mxu1 %v1654_v25 }
  0x4c   :  { %1520 = vmatprep.subr.bf16.mxu1 %v1655_v26 }
  0x4f   :  { %1521 = vmatpush3.bf16.msra.mxu1 %v1655_v26 }
  0x50   :  { %1522 = vmatprep.subr.bf16.mxu1 %v1656_v28 }
  0x51   :  { %489 = vmatmul.mubr.bf16.gmra.mxu0 %v1611_v22  ;;  %585 = vmatmul.mubr.bf16.gmra.mxu1 %v1644_v24 }
  0x52   :  { %496 = vmatprep.mubr.bf16.mxu0 %v1612_v23  ;;  %592 = vmatprep.mubr.bf16.mxu1 %v1648_v27 }
  0x53   :  { %1523 = vmatpush3.bf16.msra.mxu1 %v1656_v28 }
  0x54   :  { %1524 = vmatprep.subr.bf16.mxu1 %v1657_v30 }
  0x57   :  { %1525 = vmatpush3.bf16.msra.mxu1 %v1657_v30 }
  0x58   :  { %1526 = vmatprep.subr.bf16.mxu1 %v1658_v47 }
  0x59   :  { %497 = vmatmul.mubr.bf16.gmra.mxu0 %v1614_v29  ;;  %593 = vmatmul.mubr.bf16.gmra.mxu1 %v1650_v32 }
  0x5a   :  { %504 = vmatprep.mubr.bf16.mxu0 %v1615_v31  ;;  %600 = vmatprep.mubr.bf16.mxu1 %v1651_v33 }
  0x5b   :  { %1527 = vmatpush3.bf16.msra.mxu1 %v1658_v47 }
  0x5c   :  { %1528 = vmatprep.subr.bf16.mxu1 %v1659_v50 }
  0x5f   :  { %1529 = vmatpush3.bf16.msra.mxu1 %v1659_v50 }
  0x60   :  { %1530 = vmatprep.subr.bf16.mxu1 %v1660_v51 }
  0x61   :  { %505 = vmatmul.mubr.bf16.gmra.mxu0 %v1617_v34  ;;  %601 = vmatmul.mubr.bf16.gmra.mxu1 %v1653_v36 }
  0x62   :  { %512 = vmatprep.mubr.bf16.mxu0 %v1618_v35 }
  0x63   :  { %1531 = vmatpush3.bf16.msra.mxu1 %v1660_v51 }
  0x64   :  { %1532 = vmatprep.subr.bf16.mxu1 %v1661_v54 }
  0x67   :  { %1533 = vmatpush3.bf16.msra.mxu1 %v1661_v54 }
  0x69   :  { %513 = vmatmul.mubr.bf16.gmra.mxu0 %v1620_v37 }
  0x6a   :  { %520 = vmatprep.mubr.bf16.mxu0 %v1621_v38 }
  0x71   :  { %521 = vmatmul.mubr.bf16.gmra.mxu0 %v1623_v39 }
  0x72   :  { %528 = vmatprep.mubr.bf16.mxu0 %v1624_v40 }
  0x79   :  { %529 = vmatmul.mubr.bf16.gmra.mxu0 %v1626_v41 }
  0x7a   :  { %536 = vmatprep.mubr.bf16.mxu0 %v1627_v42 }
  0x81   :  { %537 = vmatmul.mubr.bf16.gmra.mxu0 %v1629_v43 }
  0x82   :  { %544 = vmatprep.mubr.bf16.mxu0 %v1630_v44 }
  0x89   :  { %545 = vmatmul.mubr.bf16.gmra.mxu0 %v1632_v45 }
  0x8a   :  { %552 = vmatprep.mubr.bf16.mxu0 %v1633_v46 }
  0x91   :  { %553 = vmatmul.mubr.bf16.gmra.mxu0 %v1635_v48 }
  0x92   :  { %560 = vmatprep.mubr.bf16.mxu0 %v1639_v49 }
  0x99   :  { %561 = vmatmul.mubr.bf16.gmra.mxu0 %v1641_v52 }
  0x9a   :  { %568 = vmatprep.mubr.bf16.mxu0 %v1645_v53 }
  0xa1   :  { %569 = vmatmul.mubr.bf16.gmra.mxu0 %v1647_v55 }
 0x109   :  { %v1398_v56 = vpop.f32.mrf.mxu0  ;;  %v1470_v31 = vpop.f32.mrf.mxu1 }
 0x10b   :  { %v1399_v57 = vpop.f32.mrf.mxu0  ;;  %v1471_v37 = vpop.f32.mrf.mxu1 }
 0x10c   :  { %v1400_v60 = vadd.f32 %v1399_v57, %v1398_v56 }
 0x10d   :  { %v1401_v58 = vpop.f32.mrf.mxu0  ;;  %v1473_v40 = vpop.f32.mrf.mxu1 }
 0x10f   :  { %v1402_v59 = vpop.f32.mrf.mxu0  ;;  %v1474_v46 = vpop.f32.mrf.mxu1 }
 0x110   :  { %v1403_v61 = vadd.f32 %v1402_v59, %v1401_v58 }
 0x111   :  { %v1404_v62 = vpop.f32.mrf.mxu0  ;;  %v1476_v49 = vpop.f32.mrf.mxu1 }
 0x112   :  { %v708_v63 = vpack.c.bf16 %v1403_v61, %v1400_v60 }
 0x113   :  { %v1405_v0 = vpop.f32.mrf.mxu0  ;;  %v1477_v55 = vpop.f32.mrf.mxu1 }
 0x114   :  { %1534 = vmatprep.mubr.bf16.mxu1 %v708_v63  ;;  %v1406_v3 = vadd.f32 %v1405_v0, %v1404_v62 }
 0x115   :  { %v1407_v1 = vpop.f32.mrf.mxu0  ;;  %v1479_v58 = vpop.f32.mrf.mxu1 }
 0x117   :  { %v1408_v2 = vpop.f32.mrf.mxu0  ;;  %v1480_v0 = vpop.f32.mrf.mxu1 }
 0x118   :  { %v1409_v4 = vadd.f32 %v1408_v2, %v1407_v1 }
 0x119   :  { %v1410_v5 = vpop.f32.mrf.mxu0 }
 0x11a   :  { %v709_v6 = vpack.c.bf16 %v1409_v4, %v1406_v3  ;;  %v1482_v3 = vpop.f32.mrf.mxu1 }
 0x11b   :  { %v1411_v7 = vpop.f32.mrf.mxu0 }
 0x11c   :  { %1535 = vmatmul.mubr.bf16.vlgmr.msra.gmra.mxu1 %v709_v6  ;;  %v1412_v10 = vadd.f32 %v1411_v7, %v1410_v5 }
 0x11d   :  { %v1413_v8 = vpop.f32.mrf.mxu0 }
 0x11f   :  { %v1414_v9 = vpop.f32.mrf.mxu0 }
 0x120   :  { %v1415_v11 = vadd.f32 %v1414_v9, %v1413_v8  ;;  %v1483_v9 = vpop.f32.mrf.mxu1 }
 0x121   :  { %v1416_v12 = vpop.f32.mrf.mxu0 }
 0x122   :  { %v710_v13 = vpack.c.bf16 %v1415_v11, %v1412_v10 }
 0x123   :  { %v1417_v14 = vpop.f32.mrf.mxu0 }
 0x124   :  { %1538 = vmatprep.mubr.bf16.mxu1 %v710_v13  ;;  %v1418_v17 = vadd.f32 %v1417_v14, %v1416_v12  ;;  %v1485_v12 = vpop.f32.mrf.mxu1 }
 0x125   :  { %v1419_v15 = vpop.f32.mrf.mxu0 }
 0x127   :  { %v1420_v16 = vpop.f32.mrf.mxu0 }
 0x128   :  { %v1421_v18 = vadd.f32 %v1420_v16, %v1419_v15 }
 0x129   :  { %v1422_v19 = vpop.f32.mrf.mxu0 }
 0x12a   :  { %v711_v20 = vpack.c.bf16 %v1421_v18, %v1418_v17  ;;  %v1486_v18 = vpop.f32.mrf.mxu1 }
 0x12b   :  { %v1423_v21 = vpop.f32.mrf.mxu0 }
 0x12c   :  { %1539 = vmatmul.mubr.bf16.gmra.mxu1 %v711_v20  ;;  %v1424_v24 = vadd.f32 %v1423_v21, %v1422_v19  ;;  %v1472_v20 = vadd.f32 %v1471_v37, %v1470_v31  ;;  %v1475_v21 = vadd.f32 %v1474_v46, %v1473_v40 }
 0x12d   :  { %v1425_v22 = vpop.f32.mrf.mxu0 }
 0x12f   :  { %v1426_v23 = vpop.f32.mrf.mxu0 }
 0x130   :  { %v1427_v25 = vadd.f32 %v1426_v23, %v1425_v22  ;;  %v1488_v23 = vpop.f32.mrf.mxu1 }
 0x131   :  { %v1428_v26 = vpop.f32.mrf.mxu0 }
 0x132   :  { %v712_v27 = vpack.c.bf16 %v1427_v25, %v1424_v24 }
 0x133   :  { %v1429_v28 = vpop.f32.mrf.mxu0 }
 0x134   :  { %1542 = vmatprep.mubr.bf16.mxu1 %v712_v27  ;;  %v1430_v32 = vadd.f32 %v1429_v28, %v1428_v26  ;;  %v720_v27 = vpack.c.bf16 %v1475_v21, %v1472_v20  ;;  %v1489_v28 = vpop.f32.mrf.mxu1 }
 0x135   :  { %v1431_v29 = vpop.f32.mrf.mxu0  ;;  %v1490_v31 = vadd.f32 %v1489_v28, %v1488_v23 }
 0x137   :  { %v1432_v30 = vpop.f32.mrf.mxu0 }
 0x138   :  { %v1433_v33 = vadd.f32 %v1432_v30, %v1431_v29  ;;  %v1478_v29 = vadd.f32 %v1477_v55, %v1476_v49  ;;  %v1481_v30 = vadd.f32 %v1480_v0, %v1479_v58 }
 0x139   :  { %v1434_v34 = vpop.f32.mrf.mxu0 }
 0x13a   :  { %v713_v35 = vpack.c.bf16 %v1433_v33, %v1430_v32  ;;  %v1484_v32 = vadd.f32 %v1483_v9, %v1482_v3  ;;  %v1487_v33 = vadd.f32 %v1486_v18, %v1485_v12 }
 0x13b   :  { %v1435_v36 = vpop.f32.mrf.mxu0 }
 0x13c   :  { %1543 = vmatmul.mubr.bf16.gmra.mxu1 %v713_v35  ;;  %v1436_v41 = vadd.f32 %v1435_v36, %v1434_v34  ;;  %v1491_v34 = vpop.f32.mrf.mxu1  ;;  %v721_v35 = vpack.c.bf16 %v1481_v30, %v1478_v29  ;;  %v722_v36 = vpack.c.bf16 %v1487_v33, %v1484_v32 }
 0x13d   :  { %v1437_v38 = vpop.f32.mrf.mxu0 }
 0x13f   :  { %v1438_v39 = vpop.f32.mrf.mxu0 }
 0x140   :  { %v1439_v42 = vadd.f32 %v1438_v39, %v1437_v38  ;;  %v1492_v38 = vpop.f32.mrf.mxu1 }
 0x141   :  { %v1440_v43 = vpop.f32.mrf.mxu0  ;;  %v1493_v37 = vadd.f32 %v1492_v38, %v1491_v34 }
 0x142   :  { %v714_v44 = vpack.c.bf16 %v1439_v42, %v1436_v41  ;;  %v1799_v41 = vld [vmem:[%s1842_s3] ss:$0 sm:$0xff]  ;;  %s1755_s3 = smov [#allocation9]  }
 0x143   :  { %v1441_v45 = vpop.f32.mrf.mxu0  ;;  %v723_v39 = vpack.c.bf16 %v1493_v37, %v1490_v31  ;;  %s1153_s7 = sshll.u32 %s1755_s3, 4  ;;  %s1154_s7 = int_to_ptr.vmem [resolvable:$true] %s1153_s7 }
 0x144   :  { %1546 = vmatprep.mubr.bf16.mxu1 %v714_v44  ;;  %v1442_v50 = vadd.f32 %v1441_v45, %v1440_v43  ;;  %s1722_s8 = scalar_lea.vmem %s1154_s7, 2048  ;;  %p1727_p2 = scmp.lt.s32.totalorder %s1154_s7, %s1154_s7 }
 0x145   :  { %v1443_v47 = vpop.f32.mrf.mxu0  ;;  %p1723_p1 = scmp.ne.s32.totalorder %s1154_s7, %s1722_s8  ;;  %p1728_p3 = scmp.lt.s32.totalorder %s1722_s8, %s1722_s8 }
 0x147   :  { %v1444_v48 = vpop.f32.mrf.mxu0  ;;  %p1729_p4 = por %p1728_p3, %p1727_p2 }
 0x148   :  { %v1445_v51 = vadd.f32 %v1444_v48, %v1443_v47 }
 0x149   :  { %v1446_v52 = vpop.f32.mrf.mxu0  ;;  %p1730_p5 = pnand %p1729_p4, %p1723_p1 }
 0x14a   :  { %v715_v53 = vpack.c.bf16 %v1445_v51, %v1442_v50 }
 0x14b   :  { %v1447_v54 = vpop.f32.mrf.mxu0 }
 0x14c   :  { %1547 = vmatmul.mubr.bf16.gmra.mxu1 %v715_v53  ;;  %v1448_v59 = vadd.f32 %v1447_v54, %v1446_v52 }
 0x14d   :  { %v1449_v56 = vpop.f32.mrf.mxu0 }
 0x14f   :  { %v1450_v57 = vpop.f32.mrf.mxu0 }
 0x150   :  { %v1451_v60 = vadd.f32 %v1450_v57, %v1449_v56 }
 0x151   :  { %v1452_v61 = vpop.f32.mrf.mxu0 }
 0x152   :  { %v716_v62 = vpack.c.bf16 %v1451_v60, %v1448_v59 }
 0x153   :  { %v1453_v63 = vpop.f32.mrf.mxu0 }
 0x154   :  { %1550 = vmatprep.mubr.bf16.mxu1 %v716_v62  ;;  %v1454_v4 = vadd.f32 %v1453_v63, %v1452_v61 }
 0x155   :  { %v1455_v1 = vpop.f32.mrf.mxu0 }
 0x157   :  { %v1456_v2 = vpop.f32.mrf.mxu0 }
 0x158   :  { %v1457_v5 = vadd.f32 %v1456_v2, %v1455_v1 }
 0x159   :  { %v1458_v6 = vpop.f32.mrf.mxu0 }
 0x15a   :  { %v717_v7 = vpack.c.bf16 %v1457_v5, %v1454_v4 }
 0x15b   :  { %v1459_v8 = vpop.f32.mrf.mxu0 }
 0x15c   :  { %1551 = vmatmul.mubr.bf16.gmra.mxu1 %v717_v7  ;;  %v1460_v13 = vadd.f32 %v1459_v8, %v1458_v6 }
 0x15d   :  { %v1461_v10 = vpop.f32.mrf.mxu0 }
 0x15f   :  { %v1462_v11 = vpop.f32.mrf.mxu0 }
 0x160   :  { %v1463_v14 = vadd.f32 %v1462_v11, %v1461_v10 }
 0x161   :  { %v1464_v15 = vpop.f32.mrf.mxu0 }
 0x162   :  { %v718_v16 = vpack.c.bf16 %v1463_v14, %v1460_v13 }
 0x163   :  { %v1465_v17 = vpop.f32.mrf.mxu0 }
 0x164   :  { %1554 = vmatprep.mubr.bf16.mxu1 %v718_v16  ;;  %v1466_v24 = vadd.f32 %v1465_v17, %v1464_v15 }
 0x165   :  { %v1467_v19 = vpop.f32.mrf.mxu0 }
 0x167   :  { %v1468_v22 = vpop.f32.mrf.mxu0 }
 0x168   :  { %v1469_v25 = vadd.f32 %v1468_v22, %v1467_v19 }
 0x16a   :  { %v719_v26 = vpack.c.bf16 %v1469_v25, %v1466_v24 }
 0x16c   :  { %1555 = vmatmul.mubr.bf16.gmra.mxu1 %v719_v26 }
 0x16d   :  { %1558 = vmatprep.mubr.bf16.mxu1 %v720_v27 }
 0x174   :  { %1559 = vmatmul.mubr.bf16.gmra.mxu1 %v721_v35 }
 0x175   :  { %1562 = vmatprep.mubr.bf16.mxu1 %v722_v36 }
 0x17c   :  { %1563 = vmatmul.mubr.bf16.gmra.mxu1 %v723_v39 }
 0x1dc   :  { %v1536_v40 = vpop.f32.mrf.mxu1 }
 0x1dd   :  { %v838_v43 = vadd.f32 %v1536_v40, %v1799_v41 }
 0x1de   :  { %v829_v42 = vpop.f32.mrf.mxu1 }
 0x1df   :  { %v830_v45 = vadd.f32 %v1799_v41, %v829_v42  ;;  %v958_v48 = vmax.f32 %v838_v43, 0.0 }
 0x1e0   :  { %v1537_v44 = vpop.f32.mrf.mxu1 }
 0x1e1   :  { %v841_v46 = vadd.f32 %v1537_v44, %v1799_v41  ;;  %v956_v51 = vmax.f32 %v830_v45, 0.0 }
 0x1e2   :  { %v832_v47 = vpop.f32.mrf.mxu1 }
 0x1e3   :  { %v959_v49 = vmax.f32 %v841_v46, 0.0  ;;  %v833_v50 = vadd.f32 %v1799_v41, %v832_v47 }
 0x1e5   :  { %v1295_v52 = vpack.c.bf16 %v959_v49, %v958_v48  ;;  %v957_v53 = vmax.f32 %v833_v50, 0.0 }
 0x1e7   :  { %1367 = vst [vmem:[#allocation9 + $0x8] sm:$0xff] %v1295_v52   ;;  %v1290_v54 = vpack.c.bf16 %v957_v53, %v956_v51 }
 0x1e9   :  { %1291 = vst [vmem:[#allocation9] sm:$0xff] %v1290_v54  }
 0x1ec   :  { %v1540_v55 = vpop.f32.mrf.mxu1 }
 0x1ed   :  { %v854_v57 = vadd.f32 %v1540_v55, %v1799_v41 }
 0x1ee   :  { %v845_v56 = vpop.f32.mrf.mxu1 }
 0x1ef   :  { %v846_v59 = vadd.f32 %v1799_v41, %v845_v56  ;;  %v962_v62 = vmax.f32 %v854_v57, 0.0 }
 0x1f0   :  { %v1541_v58 = vpop.f32.mrf.mxu1 }
 0x1f1   :  { %v857_v60 = vadd.f32 %v1541_v58, %v1799_v41  ;;  %v960_v1 = vmax.f32 %v846_v59, 0.0 }
 0x1f2   :  { %v848_v61 = vpop.f32.mrf.mxu1 }
 0x1f3   :  { %v963_v63 = vmax.f32 %v857_v60, 0.0  ;;  %v849_v0 = vadd.f32 %v1799_v41, %v848_v61 }
 0x1f5   :  { %v1305_v2 = vpack.c.bf16 %v963_v63, %v962_v62  ;;  %v961_v3 = vmax.f32 %v849_v0, 0.0 }
 0x1f7   :  { %1369 = vst [vmem:[#allocation9 + $0x18] sm:$0xff] %v1305_v2   ;;  %v1300_v4 = vpack.c.bf16 %v961_v3, %v960_v1 }
 0x1f9   :  { %1368 = vst [vmem:[#allocation9 + $0x10] sm:$0xff] %v1300_v4  }
 0x1fc   :  { %v1544_v5 = vpop.f32.mrf.mxu1 }
 0x1fd   :  { %v870_v7 = vadd.f32 %v1544_v5, %v1799_v41 }
 0x1fe   :  { %v861_v6 = vpop.f32.mrf.mxu1 }
 0x1ff   :  { %v862_v9 = vadd.f32 %v1799_v41, %v861_v6  ;;  %v966_v12 = vmax.f32 %v870_v7, 0.0 }
 0x200   :  { %v1545_v8 = vpop.f32.mrf.mxu1 }
 0x201   :  { %v873_v10 = vadd.f32 %v1545_v8, %v1799_v41  ;;  %v964_v15 = vmax.f32 %v862_v9, 0.0 }
 0x202   :  { %v864_v11 = vpop.f32.mrf.mxu1 }
 0x203   :  { %v967_v13 = vmax.f32 %v873_v10, 0.0  ;;  %v865_v14 = vadd.f32 %v1799_v41, %v864_v11 }
 0x205   :  { %v1315_v16 = vpack.c.bf16 %v967_v13, %v966_v12  ;;  %v965_v17 = vmax.f32 %v865_v14, 0.0 }
 0x207   :  { %1371 = vst [vmem:[#allocation9 + $0x28] sm:$0xff] %v1315_v16   ;;  %v1310_v18 = vpack.c.bf16 %v965_v17, %v964_v15 }
 0x209   :  { %1370 = vst [vmem:[#allocation9 + $0x20] sm:$0xff] %v1310_v18  }
 0x20c   :  { %v1548_v19 = vpop.f32.mrf.mxu1 }
 0x20d   :  { %v886_v21 = vadd.f32 %v1548_v19, %v1799_v41 }
 0x20e   :  { %v877_v20 = vpop.f32.mrf.mxu1 }
 0x20f   :  { %v878_v23 = vadd.f32 %v1799_v41, %v877_v20  ;;  %v970_v26 = vmax.f32 %v886_v21, 0.0 }
 0x210   :  { %v1549_v22 = vpop.f32.mrf.mxu1 }
 0x211   :  { %v889_v24 = vadd.f32 %v1549_v22, %v1799_v41  ;;  %v968_v29 = vmax.f32 %v878_v23, 0.0 }
 0x212   :  { %v880_v25 = vpop.f32.mrf.mxu1 }
 0x213   :  { %v971_v27 = vmax.f32 %v889_v24, 0.0  ;;  %v881_v28 = vadd.f32 %v1799_v41, %v880_v25 }
 0x215   :  { %v1325_v30 = vpack.c.bf16 %v971_v27, %v970_v26  ;;  %v969_v32 = vmax.f32 %v881_v28, 0.0 }
 0x217   :  { %1373 = vst [vmem:[#allocation9 + $0x38] sm:$0xff] %v1325_v30   ;;  %v1320_v33 = vpack.c.bf16 %v969_v32, %v968_v29 }
 0x219   :  { %1372 = vst [vmem:[#allocation9 + $0x30] sm:$0xff] %v1320_v33  }
 0x21c   :  { %v1552_v34 = vpop.f32.mrf.mxu1 }
 0x21d   :  { %v902_v36 = vadd.f32 %v1552_v34, %v1799_v41 }
 0x21e   :  { %v893_v35 = vpop.f32.mrf.mxu1 }
 0x21f   :  { %v894_v31 = vadd.f32 %v1799_v41, %v893_v35  ;;  %v974_v40 = vmax.f32 %v902_v36, 0.0 }
 0x220   :  { %v1553_v38 = vpop.f32.mrf.mxu1 }
 0x221   :  { %v905_v37 = vadd.f32 %v1553_v38, %v1799_v41  ;;  %v972_v44 = vmax.f32 %v894_v31, 0.0 }
 0x222   :  { %v896_v39 = vpop.f32.mrf.mxu1 }
 0x223   :  { %v975_v42 = vmax.f32 %v905_v37, 0.0  ;;  %v897_v43 = vadd.f32 %v1799_v41, %v896_v39 }
 0x225   :  { %v1335_v45 = vpack.c.bf16 %v975_v42, %v974_v40  ;;  %v973_v46 = vmax.f32 %v897_v43, 0.0 }
 0x227   :  { %1375 = vst [vmem:[#allocation9 + $0x48] sm:$0xff] %v1335_v45   ;;  %v1330_v47 = vpack.c.bf16 %v973_v46, %v972_v44 }
 0x229   :  { %1374 = vst [vmem:[#allocation9 + $0x40] sm:$0xff] %v1330_v47  }
 0x22c   :  { %v1556_v48 = vpop.f32.mrf.mxu1 }
 0x22d   :  { %v918_v50 = vadd.f32 %v1556_v48, %v1799_v41 }
 0x22e   :  { %v909_v49 = vpop.f32.mrf.mxu1 }
 0x22f   :  { %v910_v52 = vadd.f32 %v1799_v41, %v909_v49  ;;  %v978_v55 = vmax.f32 %v918_v50, 0.0 }
 0x230   :  { %v1557_v51 = vpop.f32.mrf.mxu1 }
 0x231   :  { %v921_v53 = vadd.f32 %v1557_v51, %v1799_v41  ;;  %v976_v59 = vmax.f32 %v910_v52, 0.0 }
 0x232   :  { %v912_v54 = vpop.f32.mrf.mxu1 }
 0x233   :  { %v979_v56 = vmax.f32 %v921_v53, 0.0  ;;  %v913_v57 = vadd.f32 %v1799_v41, %v912_v54 }
 0x234   :  { %v1560_v58 = vpop.f32.mrf.mxu1 }
 0x235   :  { %v1345_v60 = vpack.c.bf16 %v979_v56, %v978_v55  ;;  %v977_v61 = vmax.f32 %v913_v57, 0.0  ;;  %v934_v0 = vadd.f32 %v1560_v58, %v1799_v41 }
 0x236   :  { %v925_v62 = vpop.f32.mrf.mxu1 }
 0x237   :  { %1377 = vst [vmem:[#allocation9 + $0x58] sm:$0xff] %v1345_v60   ;;  %v1340_v63 = vpack.c.bf16 %v977_v61, %v976_v59  ;;  %v926_v2 = vadd.f32 %v1799_v41, %v925_v62  ;;  %v982_v5 = vmax.f32 %v934_v0, 0.0 }
 0x238   :  { %v1561_v1 = vpop.f32.mrf.mxu1 }
 0x239   :  { %1376 = vst [vmem:[#allocation9 + $0x50] sm:$0xff] %v1340_v63   ;;  %v937_v3 = vadd.f32 %v1561_v1, %v1799_v41  ;;  %v980_v9 = vmax.f32 %v926_v2, 0.0 }
 0x23a   :  { %v928_v4 = vpop.f32.mrf.mxu1 }
 0x23b   :  { %v983_v6 = vmax.f32 %v937_v3, 0.0  ;;  %v929_v7 = vadd.f32 %v1799_v41, %v928_v4 }
 0x23c   :  { %v1564_v8 = vpop.f32.mrf.mxu1 }
 0x23d   :  { %v1355_v10 = vpack.c.bf16 %v983_v6, %v982_v5  ;;  %v981_v11 = vmax.f32 %v929_v7, 0.0  ;;  %v950_v14 = vadd.f32 %v1564_v8, %v1799_v41 }
 0x23e   :  { %v941_v12 = vpop.f32.mrf.mxu1 }
 0x23f   :  { %1379 = vst [vmem:[#allocation9 + $0x68] sm:$0xff] %v1355_v10   ;;  %v1350_v13 = vpack.c.bf16 %v981_v11, %v980_v9  ;;  %v942_v16 = vadd.f32 %v1799_v41, %v941_v12  ;;  %v986_v19 = vmax.f32 %v950_v14, 0.0 }
 0x240   :  { %v1565_v15 = vpop.f32.mrf.mxu1 }
 0x241   :  { %1378 = vst [vmem:[#allocation9 + $0x60] sm:$0xff] %v1350_v13   ;;  %v953_v17 = vadd.f32 %v1565_v15, %v1799_v41  ;;  %v984_v22 = vmax.f32 %v942_v16, 0.0 }
 0x242   :  { %v944_v18 = vpop.f32.mrf.mxu1 }
 0x243   :  { %v987_v20 = vmax.f32 %v953_v17, 0.0  ;;  %v945_v21 = vadd.f32 %v1799_v41, %v944_v18 }
 0x245   :  { %v1365_v23 = vpack.c.bf16 %v987_v20, %v986_v19  ;;  %v985_v24 = vmax.f32 %v945_v21, 0.0 }
 0x247   :  { %1381 = vst [vmem:[#allocation9 + $0x78] sm:$0xff] %v1365_v23   ;;  %v1360_v25 = vpack.c.bf16 %v985_v24, %v984_v22 }
 0x249   :  { %1380 = vst [vmem:[#allocation9 + $0x70] sm:$0xff] %v1360_v25  }
 0x24a   :  { %1733 = shalt.err (!%p1730_p5)
}
 0x24b   :  { %1159 = dma.vmem_to_hbm [thread:$0]  %s1154_s7, 2048, %s1843_s4, [#allocation5], %s1749_s18, %s1749_s18, %s1750_s19  }
 0x24c   :  { %1746 = dma.done.wait [#allocation5], 2048  }
 0x24d   :  { %1747 = vsyncadd [#allocation5], 4294965248 }
 0x24e   :  { %1163 = vsyncpa [#allocation4], 1 }
 0x24f   :  { %1164 = vsyncpa [#allocation7], 1 }
 0x250   :  { %1165 = vsyncpa [#allocation5], 1 }

</bundles_post_ra>
